<compile_context>
chip_gen: v7x
topology: tpu7x:2x2x1
jax: 0.10.0
libtpu: 0.0.40
codegen_flags: <defaults>
</compile_context>

<pallas_src>
import jax
import jax.numpy as jnp
from jax.experimental import pallas as pl
from jax.experimental.pallas import tpu as pltpu


def mish_kernel(x_ref, o_ref):
    """Elementwise Mish on one (block_rows, LANES) tile."""
    xf = x_ref[...].astype(jnp.float32)
    # Numerically stable softplus: log(1 + e^x) = max(x, 0) + log1p(e^{-|x|})
    sp = jnp.maximum(xf, 0.0) + jnp.log1p(jnp.exp(-jnp.abs(xf)))
    o_ref[...] = (xf * jnp.tanh(sp)).astype(o_ref.dtype)


def mish(x, *, lanes=512, max_block_rows=1024):
    """Mish(x) = x * tanh(softplus(x)), any shape / dtype.

    The array is flattened and viewed as (rows, lanes) with lanes a multiple of
    128 so every load/store is lane-dense; the grid walks row blocks of up to
    max_block_rows (multiple of 8) -> ~2 MiB f32 tiles, HBM-roofline friendly.
    """
    orig_shape = x.shape
    orig_dtype = x.dtype
    total = x.size

    rows = pl.cdiv(total, lanes)
    # Block rows: multiple of 8 (sublane tiling), capped for VMEM budget.
    block_rows = min(max_block_rows, ((rows + 7) // 8) * 8)
    padded_rows = pl.cdiv(rows, block_rows) * block_rows
    padded_total = padded_rows * lanes

    flat = x.reshape(-1)
    if padded_total != total:
        flat = jnp.pad(flat, (0, padded_total - total))
    x2 = flat.reshape(padded_rows, lanes)

    grid = (padded_rows // block_rows,)
    out2 = pl.pallas_call(
        mish_kernel,
        out_shape=jax.ShapeDtypeStruct((padded_rows, lanes), orig_dtype),
        grid=grid,
        in_specs=[pl.BlockSpec((block_rows, lanes), lambda i: (i, 0))],
        out_specs=pl.BlockSpec((block_rows, lanes), lambda i: (i, 0)),
        compiler_params=pltpu.CompilerParams(
            dimension_semantics=("parallel",),
            vmem_limit_bytes=64 * 1024 * 1024,
        ),
    )(x2)

    return out2.reshape(-1)[:total].reshape(orig_shape)


def mish_ref(x):
    """Pure-JAX reference matching PyTorch: x * tanh(softplus(x))."""
    xf = x.astype(jnp.float32)
    return (xf * jnp.tanh(jax.nn.softplus(xf))).astype(x.dtype)


if __name__ == "__main__":
    key = jax.random.PRNGKey(0)
    N, C, H, W = 2, 4, 16, 16
    x = 3.0 * jax.random.normal(key, (N, C, H, W), dtype=jnp.float32)

    out = mish(x)
    out = jax.block_until_ready(out)

    ref = mish_ref(x)
    assert out.shape == x.shape and out.dtype == x.dtype
    assert jnp.allclose(out, ref, atol=1e-5, rtol=1e-5), "mismatch vs reference"

    print("KERNEL_OK")
</pallas_src>

<mosaic_0001>
module attributes {stable_mosaic.version = 11 : i64} {
  func.func @mish_kernel(%arg0: i32, %arg1: memref<8x512xf32, #tpu.memory_space<vmem>>, %arg2: memref<8x512xf32, #tpu.memory_space<vmem>>) attributes {dimension_semantics = [#tpu.dimension_semantics<parallel>], iteration_bounds = array<i64: 1>, scalar_prefetch = 0 : i64, scratch_operands = 0 : i64, tpu.core_type = #tpu.core_type<tc>, window_params = [{transform_indices = @transform_0, window_bounds = array<i64: 8, 512>}, {transform_indices = @transform_1, window_bounds = array<i64: 8, 512>}]} {
    %c0 = arith.constant 0 : index
    %c0_0 = arith.constant 0 : index
    %0 = vector.load %arg1[%c0, %c0_0] : memref<8x512xf32, #tpu.memory_space<vmem>>, vector<8x512xf32>
    %cst = arith.constant 0.000000e+00 : f32
    %1 = vector.broadcast %cst : f32 to vector<8x512xf32>
    %2 = arith.maximumf %0, %1 : vector<8x512xf32>
    %3 = math.absf %0 : vector<8x512xf32>
    %cst_1 = arith.constant 0.000000e+00 : f32
    %4 = vector.broadcast %cst_1 : f32 to vector<8x512xf32>
    %5 = arith.subf %4, %3 : vector<8x512xf32>
    %6 = math.exp %5 : vector<8x512xf32>
    %7 = math.log1p %6 : vector<8x512xf32>
    %8 = arith.addf %2, %7 : vector<8x512xf32>
    %9 = math.tanh %8 : vector<8x512xf32>
    %10 = arith.mulf %0, %9 : vector<8x512xf32>
    %c0_2 = arith.constant 0 : index
    %c0_3 = arith.constant 0 : index
    %11 = vector.load %arg2[%c0_2, %c0_3] : memref<8x512xf32, #tpu.memory_space<vmem>>, vector<8x512xf32>
    tpu.vector_store %arg2[%c0_2, %c0_3], %10 {strides = array<i32>} : memref<8x512xf32, #tpu.memory_space<vmem>>, vector<8x512xf32>,
    return
  }
  func.func @transform_0(%arg0: i32) -> (i32, i32) {
    %c0_i32 = arith.constant 0 : i32
    %c0_i32_0 = arith.constant 0 : i32
    return %arg0, %c0_i32 : i32, i32
  }
  func.func @transform_1(%arg0: i32) -> (i32, i32) {
    %c0_i32 = arith.constant 0 : i32
    %c0_i32_0 = arith.constant 0 : i32
    return %arg0, %c0_i32 : i32, i32
  }
}

</mosaic_0001>

<bundles_post_ra>
// kernel: tpu_custom_call.1
= control target key start
LH: loop header
LB: loop body
LE: loop exit
PB: predicated region body
PF: predicated region fallthrough
CT: control target
= control target key end

     0   :  { %6 = vsyncpa [#allocation3], 0  ;;  %s248_s0 = inlined_call_operand.hbm [shape: f32[8,512], index: 0, kind: input, shape index: {}]   ;;  %s249_s1 = inlined_call_operand.hbm [shape: f32[8,512], index: 1, kind: output, shape index: {}]  }
   0x1   :  { %7 = vsyncpa [#allocation4], 0  ;;  %s186_s6 = smov [#allocation2]   ;;  %s138_s10 = scalar_lea.hbm %s248_s0, 512 }
   0x2   :  { %s14_s7 = sshll.u32 %s186_s6, 4  ;;  %p139_p0 = scmp.ne.s32.totalorder %s248_s0, %s138_s10  ;;  %s15_s7 = int_to_ptr.vmem [resolvable:$true] %s14_s7 }
   0x3   :  { %p142_p1 = scmp.lt.u32.totalorder %s138_s10, %s248_s0 }
   0x5   :  { %p144_p2 = pnand %p142_p1, %p139_p0 }
   0x7   :  { %147 = shalt.err (!%p144_p2)
}
   0x8   :  { %s148_s15 = scalar_lea.vmem %s15_s7, 512  ;;  %p153_p4 = scmp.lt.s32.totalorder %s15_s7, %s15_s7 }
   0x9   :  { %p149_p3 = scmp.ne.s32.totalorder %s15_s7, %s148_s15  ;;  %p154_p5 = scmp.lt.s32.totalorder %s148_s15, %s148_s15 }
   0xb   :  { %p155_p6 = por %p154_p5, %p153_p4 }
   0xd   :  { %p156_p7 = pnand %p155_p6, %p149_p3 }
   0xf   :  { %159 = shalt.err (!%p156_p7)
}
  0x10   :  { %17 = dma.hbm_to_vmem [thread:$0]  %s248_s0, 512, %s15_s7, [#allocation3]  }
  0x11   :  { %182 = dma.done.wait [#allocation3], 512  }
  0x12   :  { %183 = vsyncadd [#allocation3], 4294966784  ;;  %v210_v0 = vld [vmem:[#allocation2] sm:$0xff]  ;;  %v212_v1 = vld [vmem:[#allocation2 + $0x8] sm:$0xff]  ;;  %s187_s0 = smov [#allocation5]  }
  0x13   :  { %v214_v2 = vld [vmem:[#allocation2 + $0x10] sm:$0xff]  ;;  %v29_v3 = vand.u32 2147483647, %v210_v0  ;;  %v30_v4 = vand.u32 2147483647, %v212_v1  ;;  %v219_v6 = vld [vmem:[#allocation2 + $0x18] sm:$0xff] }
  0x14   :  { %v31_v5 = vand.u32 2147483647, %v214_v2  ;;  %v32_v9 = vand.u32 2147483647, %v219_v6  ;;  %v25_v37 = vmax.f32 %v210_v0, 0.0  ;;  %v26_v43 = vmax.f32 %v212_v1, 0.0 }
  0x15   :  { %v33_v7 = vsub.f32 0.0, %v29_v3  ;;  %v34_v8 = vsub.f32 0.0, %v30_v4  ;;  %v27_v47 = vmax.f32 %v214_v2, 0.0  ;;  %v28_v54 = vmax.f32 %v219_v6, 0.0  ;;  %s103_s18 = sshll.u32 %s187_s0, 4  ;;  %s104_s18 = int_to_ptr.vmem [resolvable:$true] %s103_s18 }
  0x16   :  { %v35_v10 = vsub.f32 0.0, %v31_v5  ;;  %v36_v13 = vsub.f32 0.0, %v32_v9  ;;  %s160_s19 = scalar_lea.vmem %s104_s18, 512  ;;  %p165_p9 = scmp.lt.s32.totalorder %s104_s18, %s104_s18 }
  0x17   :  { %v37_v11 = vmul.f32 1.442695, %v33_v7  ;;  %v39_v12 = vmul.f32 1.442695, %v34_v8  ;;  %p161_p8 = scmp.ne.s32.totalorder %s104_s18, %s160_s19  ;;  %p166_p10 = scmp.lt.s32.totalorder %s160_s19, %s160_s19 }
  0x18   :  { %v41_v14 = vmul.f32 1.442695, %v35_v10  ;;  %v43_v15 = vmul.f32 1.442695, %v36_v13 }
  0x19   :  { %114 = vpow2.f32 %v37_v11  ;;  %p167_p11 = por %p166_p10, %p165_p9 }
  0x1a   :  { %116 = vpow2.f32 %v39_v12 }
  0x1b   :  { %118 = vpow2.f32 %v41_v14  ;;  %p168_p12 = pnand %p167_p11, %p161_p8 }
  0x1c   :  { %120 = vpow2.f32 %v43_v15 }
  0x23   :  { %v115_v16 = vpop.eup %114 }
  0x24   :  { %v117_v17 = vpop.eup %116  ;;  %v45_v18 = vadd.f32 1.0, %v115_v16  ;;  %v48_v23 = vmul.f32 -0.5, %v115_v16  ;;  %v51_v29 = vand.u32 2147483647, %v115_v16 }
  0x25   :  { %v119_v19 = vpop.eup %118  ;;  %v54_v20 = vadd.f32 1.0, %v117_v17  ;;  %v57_v24 = vmul.f32 -0.5, %v117_v17  ;;  %v60_v31 = vand.u32 2147483647, %v117_v17 }
  0x26   :  { %v121_v21 = vpop.eup %120  ;;  %122 = vlog2.f32 %v45_v18  ;;  %v63_v22 = vadd.f32 1.0, %v119_v19  ;;  %v66_v26 = vmul.f32 -0.5, %v119_v19  ;;  %v49_v27 = vadd.f32 1.0, %v48_v23 }
  0x27   :  { %124 = vlog2.f32 %v54_v20  ;;  %v72_v25 = vadd.f32 1.0, %v121_v21  ;;  %v75_v28 = vmul.f32 -0.5, %v121_v21  ;;  %v58_v30 = vadd.f32 1.0, %v57_v24 }
  0x28   :  { %126 = vlog2.f32 %v63_v22  ;;  %v67_v32 = vadd.f32 1.0, %v66_v26  ;;  %v69_v33 = vand.u32 2147483647, %v119_v19  ;;  %v50_v34 = vmul.f32 %v115_v16, %v49_v27 }
  0x29   :  { %128 = vlog2.f32 %v72_v25  ;;  %v76_v35 = vadd.f32 1.0, %v75_v28  ;;  %vm223_vm0 = vcmp.lt.f32.partialorder %v51_v29, 0.0004427343  ;;  %v59_v39 = vmul.f32 %v117_v17, %v58_v30 }
  0x2a   :  { %v78_v40 = vand.u32 2147483647, %v121_v21  ;;  %vm61_vm1 = vcmp.lt.f32.partialorder %v60_v31, 0.0004427343  ;;  %v68_v44 = vmul.f32 %v119_v19, %v67_v32  ;;  %vm70_vm2 = vcmp.lt.f32.partialorder %v69_v33, 0.0004427343 }
  0x2b   :  { %v77_v50 = vmul.f32 %v121_v21, %v76_v35 }
  0x2c   :  { %vm79_vm3 = vcmp.lt.f32.partialorder %v78_v40, 0.0004427343 }
  0x30   :  { %v123_v36 = vpop.eup %122 }
  0x31   :  { %v125_v41 = vpop.eup %124  ;;  %v47_v42 = vmul.f32 0.6931472, %v123_v36 }
  0x32   :  { %v127_v45 = vpop.eup %126  ;;  %v56_v46 = vmul.f32 0.6931472, %v125_v41 }
  0x33   :  { %v53_v48 = vsel %vm223_vm0, %v50_v34, %v47_v42  ;;  %v65_v49 = vmul.f32 0.6931472, %v127_v45  ;;  %v129_v51 = vpop.eup %128 }
  0x34   :  { %v81_v52 = vadd.f32 %v53_v48, %v25_v37  ;;  %v62_v53 = vsel %vm61_vm1, %v59_v39, %v56_v46  ;;  %v74_v57 = vmul.f32 0.6931472, %v129_v51 }
  0x35   :  { %v82_v55 = vadd.f32 %v62_v53, %v26_v43  ;;  %v71_v56 = vsel %vm70_vm2, %v68_v44, %v65_v49 }
  0x36   :  { %130 = vtanh.f32 %v81_v52  ;;  %v83_v58 = vadd.f32 %v71_v56, %v27_v47  ;;  %v80_v59 = vsel %vm79_vm3, %v77_v50, %v74_v57 }
  0x37   :  { %132 = vtanh.f32 %v82_v55  ;;  %v84_v60 = vadd.f32 %v80_v59, %v28_v54 }
  0x38   :  { %134 = vtanh.f32 %v83_v58 }
  0x39   :  { %136 = vtanh.f32 %v84_v60 }
  0x40   :  { %v131_v61 = vpop.eup %130 }
  0x41   :  { %v133_v62 = vpop.eup %132  ;;  %v89_v63 = vmul.f32 %v131_v61, %v210_v0 }
  0x42   :  { %v135_v3 = vpop.eup %134  ;;  %v90_v4 = vmul.f32 %v133_v62, %v212_v1 }
  0x43   :  { %93 = vst [vmem:[#allocation5] sm:$0xff] %v89_v63  ;;  %v91_v5 = vmul.f32 %v135_v3, %v214_v2  ;;  %v137_v7 = vpop.eup %136 }
  0x44   :  { %94 = vst [vmem:[#allocation5 + $0x8] sm:$0xff] %v90_v4  ;;  %v92_v8 = vmul.f32 %v137_v7, %v219_v6 }
  0x45   :  { %95 = vst [vmem:[#allocation5 + $0x10] sm:$0xff] %v91_v5 }
  0x46   :  { %96 = vst [vmem:[#allocation5 + $0x18] sm:$0xff] %v92_v8 }
  0x47   :  { %171 = shalt.err (!%p168_p12)
}
  0x48   :  { %s172_s22 = scalar_lea.hbm %s249_s1, 512 }
  0x49   :  { %p173_p13 = scmp.ne.s32.totalorder %s249_s1, %s172_s22  ;;  %p176_p0 = scmp.lt.u32.totalorder %s172_s22, %s249_s1 }
  0x4b   :  { %p178_p1 = pnand %p176_p0, %p173_p13 }
  0x4d   :  { %181 = shalt.err (!%p178_p1)
}
  0x4e   :  { %106 = dma.vmem_to_hbm [thread:$0]  %s104_s18, 512, %s249_s1, [#allocation4]  }
  0x4f   :  { %184 = dma.done.wait [#allocation4], 512  }
  0x50   :  { %185 = vsyncadd [#allocation4], 4294966784 }
  0x51   :  { %110 = vsyncpa [#allocation3], 1 }
  0x52   :  { %111 = vsyncpa [#allocation4], 1 }

</bundles_post_ra>
